<compile_context>
chip_gen: v7x
topology: tpu7x:2x2x1
jax: 0.10.0
libtpu: 0.0.40
codegen_flags: <defaults>
</compile_context>

<pallas_src>
import jax
import jax.numpy as jnp
from jax import lax
from jax.experimental import pallas as pl
from jax.experimental.pallas import tpu as pltpu

# ----- problem sizes (small, consistent with the module) -----
BATCH = 8
OBS_DIM = 32
ACTION_DIM = 4
HIDDEN_DIM = 32
HIDDEN_DEPTH = 2  # mlp: Linear+ReLU, (depth-1)x(Linear+ReLU), Linear


def _double_q_kernel(obs_ref, act_ref, w1o_ref, w1a_ref, b1_ref,
                     w2_ref, b2_ref, w3_ref, b3_ref, q_ref):
    """Fused twin-Q MLP: 3 matmuls total, activations are (features, tile_b)."""
    cd = w1o_ref.dtype
    # Batch-major inputs as given; cast to bf16 only at the MXU boundary.
    obs = obs_ref[...].astype(cd)                      # (tb, obs_dim)
    act = act_ref[...].astype(cd)                      # (tb, act_dim)

    # Contract feature dims: (H, F) x (B, F) -> (H, B); keeps batch on lanes.
    dn = (((1,), (1,)), ((), ()))
    h = (lax.dot_general(w1o_ref[...], obs, dn, preferred_element_type=jnp.float32)
         + lax.dot_general(w1a_ref[...], act, dn, preferred_element_type=jnp.float32)
         + b1_ref[...])                                # (2*hid, tb) f32
    h = jnp.maximum(h, 0.0).astype(cd)

    # Block-diagonal fused layer 2 (cross-head quadrants are zero).
    h = jnp.dot(w2_ref[...], h, preferred_element_type=jnp.float32) + b2_ref[...]
    h = jnp.maximum(h, 0.0).astype(cd)                 # (2*hid, tb)

    # Fused last layer already yields both heads: one lane-dense (2, tb) store.
    q_ref[...] = jnp.dot(w3_ref[...], h, preferred_element_type=jnp.float32) + b3_ref[...]


def double_q_forward(obs, action, params, *, tile_b=None, return_merged=False):
    """Fused DoubleQCritic forward. Returns (q1, q2), each (batch, 1) f32,
    or the merged (2, batch) slab if return_merged=True."""
    assert obs.shape[0] == action.shape[0]
    w1_obs, w1_act, b1, w2, b2, w3, b3 = params
    b = obs.shape[0]
    obs_dim = obs.shape[1]
    act_dim = action.shape[1]
    hid2 = w1_obs.shape[0]          # 2 * hidden_dim (both heads stacked)
    assert w1_obs.shape[1] == obs_dim and w1_act.shape[1] == act_dim

    if tile_b is None:
        # Small / odd batches (and single-TC v5e/v6e): one maximal tile -> one
        # grid step, minimal pipeline overhead. Large even batches: two
        # lane-aligned halves so v7x's two TensorCores each get a parallel step.
        if b >= 256 and b % 256 == 0:
            tile_b = b // 2
        else:
            tile_b = b
    assert b % tile_b == 0
    assert tile_b == b or tile_b % 128 == 0, "batch tile must be lane-aligned (x128)"
    grid = (b // tile_b,)

    nbytes = lambda a: a.size * a.dtype.itemsize
    in_dim = obs_dim + act_dim
    cost = pl.CostEstimate(
        flops=2 * b * (hid2 * in_dim + hid2 * hid2 + 2 * hid2),
        transcendentals=0,
        bytes_accessed=nbytes(obs) + nbytes(action)
        + sum(nbytes(p) for p in params) + 2 * b * 4,
    )

    def resident(shape):
        # Constant block index -> weights DMA'd once and reused across grid steps.
        return pl.BlockSpec(shape, lambda i: (0,) * len(shape))

    q = pl.pallas_call(
        _double_q_kernel,
        out_shape=jax.ShapeDtypeStruct((2, b), jnp.float32),
        grid=grid,
        in_specs=[
            pl.BlockSpec((tile_b, obs_dim), lambda i: (i, 0)),   # obs tile (batch-major)
            pl.BlockSpec((tile_b, act_dim), lambda i: (i, 0)),   # action tile
            resident(w1_obs.shape),                              # W1 | obs columns
            resident(w1_act.shape),                              # W1 | action columns
            resident(b1.shape),                                  # b1 (2*hid, 1)
            resident(w2.shape),                                  # block-diag W2
            resident(b2.shape),                                  # b2 (2*hid, 1)
            resident(w3.shape),                                  # fused W3 (2, 2*hid)
            resident(b3.shape),                                  # b3 (2, 1)
        ],
        out_specs=pl.BlockSpec((2, tile_b), lambda i: (0, i)),
        compiler_params=pltpu.CompilerParams(dimension_semantics=("parallel",)),
        cost_estimate=cost,
    )(obs, action, w1_obs, w1_act, b1, w2, b2, w3, b3)

    if return_merged:
        return q                      # (2, batch): skips the lane->sublane relayout
    return q[0][:, None], q[1][:, None]


def init_params(key, obs_dim, action_dim, hidden_dim, *, compute_dtype=jnp.bfloat16):
    """PyTorch-Linear-style init (uniform +/-1/sqrt(fan_in)), then fuse the two
    Q heads: W1 stacked (2*hid, in), W2 block-diagonal (2*hid, 2*hid), W3 (2, 2*hid).
    W1 is pre-split into obs/action column blocks so no concat is needed at runtime.
    MXU-fed weights are bf16; biases stay f32 (VPU math is f32)."""
    in_dim = obs_dim + action_dim

    def linear(k, fan_in, fan_out):
        kw, kb = jax.random.split(k)
        bound = fan_in ** -0.5
        w = jax.random.uniform(kw, (fan_out, fan_in), jnp.float32, -bound, bound)
        bias = jax.random.uniform(kb, (fan_out, 1), jnp.float32, -bound, bound)
        return w, bias

    keys = jax.random.split(key, 6)
    heads = []
    for h in range(2):
        heads.append((linear(keys[3 * h + 0], in_dim, hidden_dim),
                      linear(keys[3 * h + 1], hidden_dim, hidden_dim),
                      linear(keys[3 * h + 2], hidden_dim, 1)))
    (w1a, b1a), (w2a, b2a), (w3a, b3a) = heads[0]
    (w1b, b1b), (w2b, b2b), (w3b, b3b) = heads[1]

    zeros_hh = jnp.zeros((hidden_dim, hidden_dim), jnp.float32)
    zeros_1h = jnp.zeros((1, hidden_dim), jnp.float32)

    w1 = jnp.concatenate([w1a, w1b], axis=0)                       # (2*hid, in_dim)
    b1 = jnp.concatenate([b1a, b1b], axis=0)                       # (2*hid, 1)
    w2 = jnp.block([[w2a, zeros_hh], [zeros_hh, w2b]])             # (2*hid, 2*hid)
    b2 = jnp.concatenate([b2a, b2b], axis=0)                       # (2*hid, 1)
    w3 = jnp.block([[w3a, zeros_1h], [zeros_1h, w3b]])             # (2, 2*hid)
    b3 = jnp.concatenate([b3a, b3b], axis=0)                       # (2, 1)

    return (w1[:, :obs_dim].astype(compute_dtype),   # W1_obs
            w1[:, obs_dim:].astype(compute_dtype),   # W1_act
            b1.astype(jnp.float32),
            w2.astype(compute_dtype),
            b2.astype(jnp.float32),
            w3.astype(compute_dtype),
            b3.astype(jnp.float32))


def _reference(obs, action, params):
    """Pure-JAX per-head reference of DoubleQCritic.forward (same dtypes).
    Uses the un-fused per-head slices, so it also validates the head fusion."""
    w1_obs, w1_act, b1, w2, b2, w3, b3 = params
    hid = b1.shape[0] // 2
    cd = w1_obs.dtype
    x = jnp.concatenate([obs, action], axis=-1).astype(cd)        # (b, in_dim)
    w1 = jnp.concatenate([w1_obs, w1_act], axis=1)                # (2*hid, in_dim)

    outs = []
    for i in range(2):
        r = slice(i * hid, (i + 1) * hid)
        h = jnp.dot(x, w1[r].T, preferred_element_type=jnp.float32) + b1[r, 0]
        h = jnp.maximum(h, 0.0).astype(cd)
        h = jnp.dot(h, w2[r, :][:, r].T, preferred_element_type=jnp.float32) + b2[r, 0]
        h = jnp.maximum(h, 0.0).astype(cd)
        q = jnp.dot(h, w3[i, r][:, None], preferred_element_type=jnp.float32) + b3[i, 0]
        outs.append(q)                                            # (b, 1)
    return outs[0], outs[1]


if __name__ == "__main__":
    key = jax.random.PRNGKey(0)
    k_obs, k_act, k_params = jax.random.split(key, 3)

    obs = jax.random.normal(k_obs, (BATCH, OBS_DIM), jnp.float32)
    action = jax.random.normal(k_act, (BATCH, ACTION_DIM), jnp.float32)
    params = init_params(k_params, OBS_DIM, ACTION_DIM, HIDDEN_DIM)

    q1, q2 = double_q_forward(obs, action, params)
    jax.block_until_ready((q1, q2))

    r1, r2 = _reference(obs, action, params)
    assert q1.shape == (BATCH, 1) and q2.shape == (BATCH, 1)
    assert jnp.allclose(q1, r1, atol=1e-3, rtol=1e-3), float(jnp.max(jnp.abs(q1 - r1)))
    assert jnp.allclose(q2, r2, atol=1e-3, rtol=1e-3), float(jnp.max(jnp.abs(q2 - r2)))

    # TODO(synk): self.outputs dict bookkeeping is Python-side state, not a tensor op.
    print("KERNEL_OK")
</pallas_src>

<mosaic_0001>
module attributes {stable_mosaic.version = 11 : i64} {
  func.func @_double_q_kernel(%arg0: i32, %arg1: memref<8x32xf32, #tpu.memory_space<vmem>>, %arg2: memref<8x4xf32, #tpu.memory_space<vmem>>, %arg3: memref<64x32xbf16, #tpu.memory_space<vmem>>, %arg4: memref<64x4xbf16, #tpu.memory_space<vmem>>, %arg5: memref<64x1xf32, #tpu.memory_space<vmem>>, %arg6: memref<64x64xbf16, #tpu.memory_space<vmem>>, %arg7: memref<64x1xf32, #tpu.memory_space<vmem>>, %arg8: memref<2x64xbf16, #tpu.memory_space<vmem>>, %arg9: memref<2x1xf32, #tpu.memory_space<vmem>>, %arg10: memref<2x8xf32, #tpu.memory_space<vmem>>) attributes {dimension_semantics = [#tpu.dimension_semantics<parallel>], iteration_bounds = array<i64: 1>, scalar_prefetch = 0 : i64, scratch_operands = 0 : i64, tpu.core_type = #tpu.core_type<tc>, window_params = [{transform_indices = @transform_0, window_bounds = array<i64: 8, 32>}, {transform_indices = @transform_1, window_bounds = array<i64: 8, 4>}, {pipeline_mode = #tpu.pipeline_mode<synchronous>, transform_indices = @transform_2, window_bounds = array<i64: 64, 32>}, {pipeline_mode = #tpu.pipeline_mode<synchronous>, transform_indices = @transform_3, window_bounds = array<i64: 64, 4>}, {pipeline_mode = #tpu.pipeline_mode<synchronous>, transform_indices = @transform_4, window_bounds = array<i64: 64, 1>}, {pipeline_mode = #tpu.pipeline_mode<synchronous>, transform_indices = @transform_5, window_bounds = array<i64: 64, 64>}, {pipeline_mode = #tpu.pipeline_mode<synchronous>, transform_indices = @transform_6, window_bounds = array<i64: 64, 1>}, {pipeline_mode = #tpu.pipeline_mode<synchronous>, transform_indices = @transform_7, window_bounds = array<i64: 2, 64>}, {pipeline_mode = #tpu.pipeline_mode<synchronous>, transform_indices = @transform_8, window_bounds = array<i64: 2, 1>}, {transform_indices = @transform_9, window_bounds = array<i64: 2, 8>}]} {
    %c0 = arith.constant 0 : index
    %c0_0 = arith.constant 0 : index
    %0 = vector.load %arg1[%c0, %c0_0] : memref<8x32xf32, #tpu.memory_space<vmem>>, vector<8x32xf32>
    %1 = arith.truncf %0 : vector<8x32xf32> to vector<8x32xbf16>
    %c0_1 = arith.constant 0 : index
    %c0_2 = arith.constant 0 : index
    %2 = vector.load %arg2[%c0_1, %c0_2] : memref<8x4xf32, #tpu.memory_space<vmem>>, vector<8x4xf32>
    %3 = arith.truncf %2 : vector<8x4xf32> to vector<8x4xbf16>
    %c0_3 = arith.constant 0 : index
    %c0_4 = arith.constant 0 : index
    %4 = vector.load %arg3[%c0_3, %c0_4] : memref<64x32xbf16, #tpu.memory_space<vmem>>, vector<64x32xbf16>
    %cst = arith.constant dense<0.000000e+00> : vector<64x8xf32>
    %5 = tpu.matmul %4, %1, %cst {dimension_numbers = #tpu.dot_dimension_numbers<[1], [1], [0], [0], [0, 0, 1, 0], [], []>} : vector<64x32xbf16>, vector<8x32xbf16>, vector<64x8xf32> -> vector<64x8xf32>
    %c0_5 = arith.constant 0 : index
    %c0_6 = arith.constant 0 : index
    %6 = vector.load %arg4[%c0_5, %c0_6] : memref<64x4xbf16, #tpu.memory_space<vmem>>, vector<64x4xbf16>
    %cst_7 = arith.constant dense<0.000000e+00> : vector<64x8xf32>
    %7 = tpu.matmul %6, %3, %cst_7 {dimension_numbers = #tpu.dot_dimension_numbers<[1], [1], [0], [0], [0, 0, 1, 0], [], []>} : vector<64x4xbf16>, vector<8x4xbf16>, vector<64x8xf32> -> vector<64x8xf32>
    %8 = arith.addf %5, %7 : vector<64x8xf32>
    %c0_8 = arith.constant 0 : index
    %c0_9 = arith.constant 0 : index
    %9 = vector.load %arg5[%c0_8, %c0_9] : memref<64x1xf32, #tpu.memory_space<vmem>>, vector<64x1xf32>
    %10 = vector.broadcast %9 : vector<64x1xf32> to vector<64x8xf32>
    %11 = arith.addf %8, %10 : vector<64x8xf32>
    %cst_10 = arith.constant 0.000000e+00 : f32
    %12 = vector.broadcast %cst_10 : f32 to vector<64x8xf32>
    %13 = arith.maximumf %11, %12 : vector<64x8xf32>
    %14 = arith.truncf %13 : vector<64x8xf32> to vector<64x8xbf16>
    %c0_11 = arith.constant 0 : index
    %c0_12 = arith.constant 0 : index
    %15 = vector.load %arg6[%c0_11, %c0_12] : memref<64x64xbf16, #tpu.memory_space<vmem>>, vector<64x64xbf16>
    %cst_13 = arith.constant dense<0.000000e+00> : vector<64x8xf32>
    %16 = tpu.matmul %15, %14, %cst_13 {dimension_numbers = #tpu.dot_dimension_numbers<[1], [0], [0], [1], [0, 0, 1, 1], [], []>} : vector<64x64xbf16>, vector<64x8xbf16>, vector<64x8xf32> -> vector<64x8xf32>
    %c0_14 = arith.constant 0 : index
    %c0_15 = arith.constant 0 : index
    %17 = vector.load %arg7[%c0_14, %c0_15] : memref<64x1xf32, #tpu.memory_space<vmem>>, vector<64x1xf32>
    %18 = vector.broadcast %17 : vector<64x1xf32> to vector<64x8xf32>
    %19 = arith.addf %16, %18 : vector<64x8xf32>
    %cst_16 = arith.constant 0.000000e+00 : f32
    %20 = vector.broadcast %cst_16 : f32 to vector<64x8xf32>
    %21 = arith.maximumf %19, %20 : vector<64x8xf32>
    %22 = arith.truncf %21 : vector<64x8xf32> to vector<64x8xbf16>
    %c0_17 = arith.constant 0 : index
    %c0_18 = arith.constant 0 : index
    %23 = vector.load %arg8[%c0_17, %c0_18] : memref<2x64xbf16, #tpu.memory_space<vmem>>, vector<2x64xbf16>
    %cst_19 = arith.constant dense<0.000000e+00> : vector<2x8xf32>
    %24 = tpu.matmul %23, %22, %cst_19 {dimension_numbers = #tpu.dot_dimension_numbers<[1], [0], [0], [1], [0, 0, 1, 1], [], []>} : vector<2x64xbf16>, vector<64x8xbf16>, vector<2x8xf32> -> vector<2x8xf32>
    %c0_20 = arith.constant 0 : index
    %c0_21 = arith.constant 0 : index
    %25 = vector.load %arg9[%c0_20, %c0_21] : memref<2x1xf32, #tpu.memory_space<vmem>>, vector<2x1xf32>
    %26 = vector.broadcast %25 : vector<2x1xf32> to vector<2x8xf32>
    %27 = arith.addf %24, %26 : vector<2x8xf32>
    %c0_22 = arith.constant 0 : index
    %c0_23 = arith.constant 0 : index
    %28 = vector.load %arg10[%c0_22, %c0_23] : memref<2x8xf32, #tpu.memory_space<vmem>>, vector<2x8xf32>
    tpu.vector_store %arg10[%c0_22, %c0_23], %27 {strides = array<i32>} : memref<2x8xf32, #tpu.memory_space<vmem>>, vector<2x8xf32>,
    return
  }
  func.func @transform_0(%arg0: i32) -> (i32, i32) {
    %c0_i32 = arith.constant 0 : i32
    %c0_i32_0 = arith.constant 0 : i32
    return %arg0, %c0_i32 : i32, i32
  }
  func.func @transform_1(%arg0: i32) -> (i32, i32) {
    %c0_i32 = arith.constant 0 : i32
    %c0_i32_0 = arith.constant 0 : i32
    return %arg0, %c0_i32 : i32, i32
  }
  func.func @transform_2(%arg0: i32) -> (i32, i32) {
    %c0_i32 = arith.constant 0 : i32
    %c0_i32_0 = arith.constant 0 : i32
    %c0_i32_1 = arith.constant 0 : i32
    return %c0_i32, %c0_i32_0 : i32, i32
  }
  func.func @transform_3(%arg0: i32) -> (i32, i32) {
    %c0_i32 = arith.constant 0 : i32
    %c0_i32_0 = arith.constant 0 : i32
    %c0_i32_1 = arith.constant 0 : i32
    return %c0_i32, %c0_i32_0 : i32, i32
  }
  func.func @transform_4(%arg0: i32) -> (i32, i32) {
    %c0_i32 = arith.constant 0 : i32
    %c0_i32_0 = arith.constant 0 : i32
    %c0_i32_1 = arith.constant 0 : i32
    return %c0_i32, %c0_i32_0 : i32, i32
  }
  func.func @transform_5(%arg0: i32) -> (i32, i32) {
    %c0_i32 = arith.constant 0 : i32
    %c0_i32_0 = arith.constant 0 : i32
    %c0_i32_1 = arith.constant 0 : i32
    return %c0_i32, %c0_i32_0 : i32, i32
  }
  func.func @transform_6(%arg0: i32) -> (i32, i32) {
    %c0_i32 = arith.constant 0 : i32
    %c0_i32_0 = arith.constant 0 : i32
    %c0_i32_1 = arith.constant 0 : i32
    return %c0_i32, %c0_i32_0 : i32, i32
  }
  func.func @transform_7(%arg0: i32) -> (i32, i32) {
    %c0_i32 = arith.constant 0 : i32
    %c0_i32_0 = arith.constant 0 : i32
    %c0_i32_1 = arith.constant 0 : i32
    return %c0_i32, %c0_i32_0 : i32, i32
  }
  func.func @transform_8(%arg0: i32) -> (i32, i32) {
    %c0_i32 = arith.constant 0 : i32
    %c0_i32_0 = arith.constant 0 : i32
    %c0_i32_1 = arith.constant 0 : i32
    return %c0_i32, %c0_i32_0 : i32, i32
  }
  func.func @transform_9(%arg0: i32) -> (i32, i32) {
    %c0_i32 = arith.constant 0 : i32
    %c0_i32_0 = arith.constant 0 : i32
    return %c0_i32, %arg0 : i32, i32
  }
}

</mosaic_0001>

<bundles_post_ra>
// kernel: tpu_custom_call.1
= control target key start
LH: loop header
LB: loop body
LE: loop exit
PB: predicated region body
PF: predicated region fallthrough
CT: control target
= control target key end

     0   :  { %vm74_vm0 = vcmask 31744   ;;  %vm175_vm1 = vcmask 261120   ;;  %v704_v6 = vmov 0   ;;  %s883_s0 = inlined_call_operand.vmem [shape: f32[8,32], index: 0, kind: input, shape index: {}]   ;;  %s884_s1 = inlined_call_operand.vmem [shape: f32[8,4], index: 1, kind: input, shape index: {}]   ;;  %s885_s2 = inlined_call_operand.vmem [shape: bf16[64,32], index: 2, kind: input, shape index: {}]   ;;  %s886_s3 = inlined_call_operand.vmem [shape: bf16[64,4], index: 3, kind: input, shape index: {}]   ;;  %s887_s4 = inlined_call_operand.vmem [shape: f32[64,1], index: 4, kind: input, shape index: {}]   ;;  %s888_s5 = inlined_call_operand.vmem [shape: bf16[64,64], index: 5, kind: input, shape index: {}]   ;;  %s889_s6 = inlined_call_operand.vmem [shape: f32[64,1], index: 6, kind: input, shape index: {}]   ;;  %s890_s7 = inlined_call_operand.vmem [shape: bf16[2,64], index: 7, kind: input, shape index: {}]   ;;  %s891_s8 = inlined_call_operand.vmem [shape: f32[2,1], index: 8, kind: input, shape index: {}]   ;;  %s892_s9 = inlined_call_operand.hbm [shape: f32[2,8], index: 9, kind: output, shape index: {}]  }
   0x1   :  { %v36_v0 = vld [vmem:[%s884_s1] sm:$0xff]  ;;  %666 = vset.pattern.permute.xlu0 %v704_v6  ;;  %667 = vset.pattern.permute.xlu1 %v704_v6  ;;  %v669_v7 = vld [vmem:[%s886_s3 + $0x8] sm:$0xff]   ;;  %v670_v8 = vld [vmem:[%s886_s3 + $0x10] sm:$0xff]  }
   0x2   :  { %v37_v1 = vpack.c.bf16 %v36_v0, %v36_v0  ;;  %v668_v2 = vld [vmem:[%s886_s3] sm:$0xff]   ;;  %v258_v11 = vld [vmem:[%s887_s4 + $0x10] sm:$0xff]  ;;  %v257_v12 = vld [vmem:[%s887_s4 + $0x8] sm:$0xff] }
   0x3   :  { %v34_v3 = vld [vmem:[%s883_s0] sm:$0xff]  ;;  %606 = vmatprep.mubr.msk.bf16.mxu0 %vm74_vm0, %v668_v2  ;;  %276 = vperm.xlu1 %667, %v258_v11   ;;  %v259_v13 = vld [vmem:[%s887_s4 + $0x18] sm:$0xff]  ;;  %v261_v17 = vld [vmem:[%s887_s4 + $0x28] sm:$0xff] }
   0x4   :  { %660 = vmatprep.subr.msk.bf16.mxu0 %vm74_vm0, %v37_v1  ;;  %v88_v4 = vsel %vm74_vm0, %v37_v1, 0  ;;  %v35_v5 = vpack.c.bf16 %v34_v3, %v34_v3  ;;  %v256_v9 = vld [vmem:[%s887_s4] sm:$0xff]  ;;  %v671_v14 = vld [vmem:[%s886_s3 + $0x18] sm:$0xff]  }
   0x5   :  { %605 = vmatpush3.bf16.xpose.msra.mxu0 %v88_v4  ;;  %266 = vperm.xlu0 %666, %v256_v9   ;;  %v260_v15 = vld [vmem:[%s887_s4 + $0x20] sm:$0xff] }
   0x6   :  { %661 = vmatprep.subr.msk.bf16.mxu0 %vm175_vm1, %v35_v5  ;;  %v189_v10 = vsel %vm175_vm1, %v35_v5, 0  ;;  %v672_v16 = vld [vmem:[%s885_s2] sm:$0xff]  }
   0x7   :  { %281 = vperm.xlu1 %667, %v259_v13  }
   0x9   :  { %271 = vperm.xlu0 %666, %v257_v12  }
   0xc   :  { %607 = vmatmul.mubr.msk.bf16.vlgmr.msra.gmra.mrb[0].mxu0 %vm74_vm0, %v669_v7 }
   0xd   :  { %615 = vmatpush3.bf16.xpose.msra.mxu0 %v189_v10  ;;  %610 = vmatprep.mubr.msk.bf16.mxu0 %vm74_vm0, %v670_v8 }
   0xe   :  { %286 = vperm.xlu0 %666, %v260_v15  }
   0xf   :  { %14 = vsyncpa [#allocation3], 0  ;;  %v262_v18 = vld [vmem:[%s887_s4 + $0x30] sm:$0xff]  ;;  %291 = vperm.xlu1 %667, %v261_v17   ;;  %v263_v19 = vld [vmem:[%s887_s4 + $0x38] sm:$0xff]  ;;  %vm400_vm2 = vcmask 523264   ;;  %v705_v8 = vmov 0.0  }
  0x10   :  { %v332_v20 = vld [vmem:[%s889_s6] sm:$0xff]  ;;  %v673_v21 = vld [vmem:[%s885_s2 + $0x8] sm:$0xff]   ;;  %v674_v23 = vld [vmem:[%s885_s2 + $0x10] sm:$0xff]   ;;  %vm706_vm3 = vmmov 0   ;;  %s707_s18 = smov [#allocation2]   ;;  %vm540_vm4 = vcmask 58368  }
  0x11   :  { %v333_v22 = vld [vmem:[%s889_s6 + $0x8] sm:$0xff]  ;;  %v334_v24 = vld [vmem:[%s889_s6 + $0x10] sm:$0xff]  ;;  %v335_v25 = vld [vmem:[%s889_s6 + $0x18] sm:$0xff]  ;;  %s548_s19 = sshll.u32 %s707_s18, 4  ;;  %s549_s19 = int_to_ptr.vmem [resolvable:$true] %s548_s19 }
  0x12   :  { %296 = vperm.xlu0 %666, %v262_v18   ;;  %v336_v26 = vld [vmem:[%s889_s6 + $0x20] sm:$0xff]  ;;  %v675_v27 = vld [vmem:[%s885_s2 + $0x18] sm:$0xff]   ;;  %v337_v28 = vld [vmem:[%s889_s6 + $0x28] sm:$0xff]  ;;  %s680_s20 = scalar_lea.vmem %s549_s19, 32  ;;  %p685_p1 = scmp.lt.s32.totalorder %s549_s19, %s549_s19 }
  0x13   :  { %301 = vperm.xlu1 %667, %v263_v19   ;;  %v338_v29 = vld [vmem:[%s889_s6 + $0x30] sm:$0xff]  ;;  %v339_v30 = vld [vmem:[%s889_s6 + $0x38] sm:$0xff]  ;;  %v491_v31 = vld [vmem:[%s891_s8] sm:$0x3]  ;;  %p681_p0 = scmp.ne.s32.totalorder %s549_s19, %s680_s20  ;;  %p686_p2 = scmp.lt.s32.totalorder %s680_s20, %s680_s20 }
  0x14   :  { %611 = vmatmul.mubr.msk.bf16.gmra.mrb[4].mxu0 %vm74_vm0, %v671_v14  ;;  %v676_v32 = vld [vmem:[%s888_s5] sm:$0xff]   ;;  %v677_v5 = vld [vmem:[%s888_s5 + $0x8] sm:$0xff]   ;;  %v678_v6 = vld [vmem:[%s888_s5 + $0x10] sm:$0xff]  }
  0x15   :  { %616 = vmatprep.mubr.msk.bf16.mxu0 %vm175_vm1, %v672_v16  ;;  %632 = vmatprep.mubr.msk.bf16.mxu1 %vm400_vm2, %v676_v32  ;;  %v679_v7 = vld [vmem:[%s888_s5 + $0x18] sm:$0xff]   ;;  %p687_p3 = por %p686_p2, %p685_p1 }
  0x16   :  { %342 = vperm.xlu0 %666, %v332_v20  }
  0x17   :  { %347 = vperm.xlu1 %667, %v333_v22   ;;  %p688_p4 = pnand %p687_p3, %p681_p0 }
  0x1a   :  { %352 = vperm.xlu0 %666, %v334_v24  }
  0x1b   :  { %357 = vperm.xlu1 %667, %v335_v25  }
  0x1c   :  { %617 = vmatmul.mubr.msk.bf16.vlgmr.msra.gmra.mrb[0].mxu0 %vm175_vm1, %v673_v21 }
  0x1d   :  { %620 = vmatprep.mubr.msk.bf16.mxu0 %vm175_vm1, %v674_v23 }
  0x1e   :  { %362 = vperm.xlu0 %666, %v336_v26  }
  0x1f   :  { %367 = vperm.xlu1 %667, %v337_v28  }
  0x22   :  { %372 = vperm.xlu0 %666, %v338_v29  }
  0x23   :  { %377 = vperm.xlu1 %667, %v339_v30  }
  0x24   :  { %621 = vmatmul.mubr.msk.bf16.gmra.mrb[4].mxu0 %vm175_vm1, %v675_v27 }
  0x26   :  { %494 = vperm.xlu0 %666, %v491_v31  }
  0x82   :  { %v277_v34 = vpop.permute.xlu1 %276 }
  0x84   :  { %v267_v33 = vpop.permute.xlu0 %266 }
  0x86   :  { %v282_v36 = vpop.permute.xlu1 %281 }
  0x88   :  { %v272_v35 = vpop.permute.xlu0 %271 }
  0x8d   :  { %v287_v40 = vpop.permute.xlu0 %286 }
  0x8e   :  { %v292_v45 = vpop.permute.xlu1 %291 }
  0x91   :  { %v297_v52 = vpop.permute.xlu0 %296 }
  0x92   :  { %v302_v57 = vpop.permute.xlu1 %301 }
  0x95   :  { %v343_v9 = vpop.permute.xlu0 %342 }
  0x96   :  { %v348_v10 = vpop.permute.xlu1 %347 }
  0x99   :  { %v353_v11 = vpop.permute.xlu0 %352 }
  0x9a   :  { %v358_v12 = vpop.permute.xlu1 %357 }
  0x9d   :  { %v363_v16 = vpop.permute.xlu0 %362 }
  0x9e   :  { %v368_v21 = vpop.permute.xlu1 %367 }
  0xa1   :  { %v373_v28 = vpop.permute.xlu0 %372 }
  0xef   :  { %v618_v37 = vpop.f32.mrb[0].mxu0 }
  0xf0   :  { %v306_v38 = vadd.f32 %v618_v37, %v277_v34  ;;  %v225_v39 = vpop.f32.mrb[1].mxu0 }
  0xf1   :  { %v304_v41 = vadd.f32 %v267_v33, %v225_v39  ;;  %v619_v42 = vpop.f32.mrb[2].mxu0  ;;  %v378_v33 = vpop.permute.xlu1 %377 }
  0xf2   :  { %v307_v43 = vadd.f32 %v619_v42, %v282_v36  ;;  %v228_v44 = vpop.f32.mrb[3].mxu0  ;;  %v314_v47 = vmax.f32 %v306_v38, 0.0 }
  0xf3   :  { %v305_v46 = vadd.f32 %v272_v35, %v228_v44  ;;  %v312_v49 = vmax.f32 %v304_v41, 0.0 }
  0xf4   :  { %v315_v48 = vmax.f32 %v307_v43, 0.0 }
  0xf5   :  { %v313_v50 = vmax.f32 %v305_v46, 0.0  ;;  %v495_v46 = vpop.permute.xlu0 %494 }
  0xf6   :  { %v321_v51 = vpack.c.bf16 %v315_v48, %v314_v47 }
  0xf7   :  { %v622_v53 = vpop.f32.mrb[4].mxu0  ;;  %v320_v54 = vpack.c.bf16 %v313_v50, %v312_v49 }
  0xf8   :  { %v310_v55 = vadd.f32 %v622_v53, %v297_v52  ;;  %v241_v56 = vpop.f32.mrb[5].mxu0 }
  0xf9   :  { %v308_v58 = vadd.f32 %v287_v40, %v241_v56  ;;  %v623_v59 = vpop.f32.mrb[6].mxu0  ;;  %624 = vmatprep.subr.bf16.mxu1 %v320_v54 }
  0xfa   :  { %v311_v60 = vadd.f32 %v623_v59, %v302_v57  ;;  %v244_v61 = vpop.f32.mrb[7].mxu0  ;;  %625 = vmatpush3.bf16.msra.mxu1 %v320_v54  ;;  %v318_v63 = vmax.f32 %v310_v55, 0.0 }
  0xfb   :  { %v309_v62 = vadd.f32 %v292_v45, %v244_v61  ;;  %626 = vmatprep.subr.bf16.mxu1 %v321_v51  ;;  %v316_v1 = vmax.f32 %v308_v58, 0.0  ;;  %v490_v45 = vld [vmem:[%s890_s7] sm:$0x1] }
  0xfc   :  { %v319_v0 = vmax.f32 %v311_v60, 0.0 }
  0xfd   :  { %v317_v2 = vmax.f32 %v309_v62, 0.0 }
  0xfe   :  { %v323_v3 = vpack.c.bf16 %v319_v0, %v318_v63  ;;  %627 = vmatpush3.bf16.msra.mxu1 %v321_v51 }
  0xff   :  { %v322_v4 = vpack.c.bf16 %v317_v2, %v316_v1 }
 0x101   :  { %628 = vmatprep.subr.bf16.mxu1 %v322_v4 }
 0x102   :  { %629 = vmatpush3.bf16.msra.mxu1 %v322_v4 }
 0x103   :  { %630 = vmatprep.subr.bf16.mxu1 %v323_v3 }
 0x106   :  { %631 = vmatpush3.bf16.msra.mxu1 %v323_v3 }
 0x107   :  { %640 = vmatprep.subr.bf16.mxu1 %v705_v8 }
 0x109   :  { %633 = vmatmul.mubr.msk.bf16.vlgmr.msra.gmra.mrb[0].mxu1 %vm400_vm2, %v677_v5 }
 0x10a   :  { %636 = vmatprep.mubr.msk.bf16.mxu1 %vm400_vm2, %v678_v6 }
 0x111   :  { %637 = vmatmul.mubr.msk.bf16.gmra.mrb[4].mxu1 %vm400_vm2, %v679_v7 }
 0x112   :  { %648 = vmatprep.mubr.msk.bf16.mxu1 %vm706_vm3, %v705_v8 }
 0x1dc   :  { %v634_v13 = vpop.f32.mrb[0].mxu1 }
 0x1dd   :  { %v456_v14 = vadd.f32 %v634_v13, %v353_v11  ;;  %v447_v15 = vpop.f32.mrb[1].mxu1 }
 0x1de   :  { %v448_v17 = vadd.f32 %v447_v15, %v343_v9  ;;  %v635_v18 = vpop.f32.mrb[2].mxu1 }
 0x1df   :  { %v459_v19 = vadd.f32 %v635_v18, %v358_v12  ;;  %v450_v20 = vpop.f32.mrb[3].mxu1  ;;  %v480_v23 = vmax.f32 %v456_v14, 0.0 }
 0x1e0   :  { %v451_v22 = vadd.f32 %v450_v20, %v348_v10  ;;  %v478_v25 = vmax.f32 %v448_v17, 0.0 }
 0x1e1   :  { %v481_v24 = vmax.f32 %v459_v19, 0.0 }
 0x1e2   :  { %v479_v26 = vmax.f32 %v451_v22, 0.0 }
 0x1e3   :  { %v487_v27 = vpack.c.bf16 %v481_v24, %v480_v23 }
 0x1e4   :  { %v486_v29 = vpack.c.bf16 %v479_v26, %v478_v25  ;;  %v638_v30 = vpop.f32.mrb[4].mxu1 }
 0x1e5   :  { %v472_v31 = vadd.f32 %v638_v30, %v373_v28  ;;  %v463_v32 = vpop.f32.mrb[5].mxu1 }
 0x1e6   :  { %v464_v34 = vadd.f32 %v463_v32, %v363_v16  ;;  %v639_v35 = vpop.f32.mrb[6].mxu1  ;;  %641 = vmatpush3.bf16.msra.mxu1 %v486_v29 }
 0x1e7   :  { %v475_v36 = vadd.f32 %v639_v35, %v378_v33  ;;  %v466_v37 = vpop.f32.mrb[7].mxu1  ;;  %642 = vmatprep.subr.bf16.mxu1 %v705_v8  ;;  %v484_v39 = vmax.f32 %v472_v31, 0.0 }
 0x1e8   :  { %v467_v38 = vadd.f32 %v466_v37, %v368_v21  ;;  %v482_v41 = vmax.f32 %v464_v34, 0.0 }
 0x1e9   :  { %v485_v40 = vmax.f32 %v475_v36, 0.0 }
 0x1ea   :  { %v483_v42 = vmax.f32 %v467_v38, 0.0  ;;  %643 = vmatpush3.bf16.msra.mxu1 %v487_v27 }
 0x1eb   :  { %v489_v43 = vpack.c.bf16 %v485_v40, %v484_v39  ;;  %644 = vmatprep.subr.bf16.mxu1 %v705_v8 }
 0x1ec   :  { %v488_v44 = vpack.c.bf16 %v483_v42, %v482_v41 }
 0x1ee   :  { %645 = vmatpush3.bf16.msra.mxu1 %v488_v44 }
 0x1ef   :  { %646 = vmatprep.subr.bf16.mxu1 %v705_v8 }
 0x1f2   :  { %647 = vmatpush3.bf16.msra.mxu1 %v489_v43 }
 0x1f5   :  { %649 = vmatmul.mubr.msk.bf16.vlgmr.msra.gmra.mrb[8].mxu1 %vm400_vm2, %v490_v45 }
 0x2c8   :  { %v534_v47 = vpop.f32.mrb[8].mxu1 }
 0x2c9   :  { %v535_v48 = vadd.f32 %v534_v47, %v495_v46  ;;  %v650_v49 = vpop.f32.mrb[9].mxu1 }
 0x2ca   :  { %v537_v50 = vpop.f32.mrb[10].mxu1 }
 0x2cb   :  { %v651_v51 = vpop.f32.mrb[11].mxu1  ;;  %541 = vst.msk [vmem:[#allocation2] sm:$0x3] %vm540_vm4, %v535_v48 }
 0x2cc   :  { %691 = shalt.err (!%p688_p4)
}
 0x2cd   :  { %s692_s21 = scalar_lea.hbm %s892_s9, 32 }
 0x2ce   :  { %p693_p5 = scmp.ne.s32.totalorder %s892_s9, %s692_s21  ;;  %p696_p6 = scmp.lt.u32.totalorder %s692_s21, %s892_s9 }
 0x2d0   :  { %p698_p7 = pnand %p696_p6, %p693_p5 }
 0x2d2   :  { %701 = shalt.err (!%p698_p7)
}
 0x2d3   :  { %551 = dma.vmem_to_hbm [thread:$0]  %s549_s19, 32, %s892_s9, [#allocation3]  }
 0x2d4   :  { %702 = dma.done.wait [#allocation3], 32  }
 0x2d5   :  { %703 = vsyncadd [#allocation3], 4294967264 }
 0x2d6   :  { %555 = vsyncpa [#allocation3], 1 }

</bundles_post_ra>
